<compile_context>
chip_gen: v7x
topology: tpu7x:2x2x1
jax: 0.10.0
libtpu: 0.0.40
codegen_flags: <defaults>
</compile_context>

<pallas_src>
import math

import jax
import jax.numpy as jnp
from jax.experimental import pallas as pl
from jax.experimental.pallas import tpu as pltpu


# Per-block byte budget.  ~1 MiB blocks already reach ~85% of the HBM roofline
# (measured sweeps); with default double-buffering of one input and one output
# block the kernel stays around 4 MiB of VMEM on every generation.
_BLOCK_BUDGET = 1 << 20
_MAX_TILE = 512  # max tile edge for the 2-D tiled path (multiple of 128)


def _pick_tile(dim: int) -> int:
    """Tile edge for one of the last-two dims.

    Must be a multiple of 128 (lane-dense on both the load and the store side
    of the transpose; satisfies the packed-tiling rule for every dtype) or
    equal to the full dim.  Prefer an exact divisor so edge blocks are full;
    otherwise fall back to 512 and let the pl.cdiv grid handle the ragged edge
    with clipped DMAs (no wrapper-side padding, no phantom HBM traffic).
    """
    if dim <= _MAX_TILE:
        return dim
    for cand in (512, 384, 256, 128):
        if dim % cand == 0:
            return cand
    return _MAX_TILE


# ---------------------------------------------------------------------------
# Kernels
# ---------------------------------------------------------------------------
def _transpose_tile_kernel(x_ref, o_ref):
    # x_ref: (th, tw) tile in VMEM; o_ref: (tw, th) tile (XLU transpose path).
    o_ref[...] = x_ref[...].T


def _transpose_slab_kernel(x_ref, o_ref):
    # x_ref: (nb, H, W) slab; o_ref: (nb, W, H) slab.  A single 3-D minor-dim
    # transpose lets Mosaic schedule one fused XLU/store sequence instead of
    # nb separately unrolled 2-D transposes.
    o_ref[...] = jnp.swapaxes(x_ref[...], 1, 2)


# ---------------------------------------------------------------------------
# Wrappers
# ---------------------------------------------------------------------------
def _transpose_slabbed(x3: jax.Array) -> jax.Array:
    """Whole (H, W) planes per block; the leading axis is blocked into ~1 MiB
    slabs so many-small-matrix inputs take a handful of grid steps, not N."""
    N, H, W = x3.shape
    dsize = x3.dtype.itemsize
    slab_bytes = H * W * dsize
    nb = max(1, min(N, _BLOCK_BUDGET // slab_bytes))
    cost = pl.CostEstimate(flops=0, transcendentals=0,
                           bytes_accessed=2 * N * H * W * dsize)
    return pl.pallas_call(
        _transpose_slab_kernel,
        out_shape=jax.ShapeDtypeStruct((N, W, H), x3.dtype),
        grid_spec=pltpu.PrefetchScalarGridSpec(
            num_scalar_prefetch=0,
            grid=(pl.cdiv(N, nb),),
            # Last two dims are full-extent (full-dim exception to the (8,128)
            # rule); the leading dim is blocked, and a ragged final slab is
            # handled by clipped DMAs on the cdiv grid.
            in_specs=[pl.BlockSpec((nb, H, W), lambda i: (i, 0, 0))],
            out_specs=pl.BlockSpec((nb, W, H), lambda i: (i, 0, 0)),
        ),
        compiler_params=pltpu.CompilerParams(
            dimension_semantics=("parallel",)),
        cost_estimate=cost,
    )(x3)


def _transpose_tiled(x3: jax.Array) -> jax.Array:
    """2-D tiling of the last two dims with a pl.cdiv grid (no padding)."""
    N, H, W = x3.shape
    dsize = x3.dtype.itemsize
    th = _pick_tile(H)
    tw = _pick_tile(W)
    cost = pl.CostEstimate(flops=0, transcendentals=0,
                           bytes_accessed=2 * N * H * W * dsize)
    # TODO(synk): when H < 128 the output's last dim forces masked partial
    # stores; folding the batch axis into the lane dim would make the stores
    # lane-dense, at the cost of a more involved layout fixup.
    return pl.pallas_call(
        _transpose_tile_kernel,
        out_shape=jax.ShapeDtypeStruct((N, W, H), x3.dtype),
        grid_spec=pltpu.PrefetchScalarGridSpec(
            num_scalar_prefetch=0,
            grid=(N, pl.cdiv(H, th), pl.cdiv(W, tw)),
            in_specs=[pl.BlockSpec((None, th, tw), lambda n, i, j: (n, i, j))],
            # The output tile is the transposed tile at swapped block coords.
            # Ragged edge blocks: the out-of-bounds (undefined) input elements
            # land exactly on out-of-bounds output positions, whose writeback
            # is dropped, so no in-kernel masking is needed.
            out_specs=pl.BlockSpec((None, tw, th), lambda n, i, j: (n, j, i)),
        ),
        compiler_params=pltpu.CompilerParams(
            dimension_semantics=("parallel", "parallel", "parallel")),
        cost_estimate=cost,
    )(x3)


def pallas_transpose_last2(x: jax.Array) -> jax.Array:
    """Swap the last two dims of an N-D array using a Pallas TPU kernel."""
    if x.ndim < 2:
        raise ValueError("need at least 2 dims to transpose the last two")
    *lead, H, W = x.shape
    N = math.prod(lead) if lead else 1
    x3 = x.reshape(N, H, W)
    if H * W * x3.dtype.itemsize <= _BLOCK_BUDGET:
        out3 = _transpose_slabbed(x3)
    else:
        out3 = _transpose_tiled(x3)
    return out3.reshape(*lead, W, H)


class ModelDirectJax:
    """JAX/Pallas equivalent of the PyTorch ModelDirect wrapper for torch.transpose."""

    model_name = "model_op_src_from_host"

    def __init__(self, opname: str, shape, kwargs):
        self.testname = (
            "Transpose_pytorch_operator_" + opname + "_test_op_src_from_host"
        )
        self.opname = opname
        self.shape = shape
        self.kwargs = kwargs  # expected: {"dim0": -2, "dim1": -1}

    def __call__(self, x: jax.Array) -> jax.Array:
        dim0 = self.kwargs.get("dim0", -2) % x.ndim
        dim1 = self.kwargs.get("dim1", -1) % x.ndim
        assert {dim0, dim1} == {x.ndim - 2, x.ndim - 1}, (
            "This Pallas implementation covers the last-two-dim transpose case."
        )
        # TODO(synk): arbitrary (dim0, dim1) pairs (leading-axis swaps) would
        # only need an index_map permutation, but are not implemented here.
        return pallas_transpose_last2(x)


if __name__ == "__main__":
    key = jax.random.PRNGKey(0)
    k1, k2, k3 = jax.random.split(key, 3)

    # Small shape consistent with the module (batch=2, channels=4, 16x32).
    x = jax.random.normal(k1, (2, 4, 16, 32), dtype=jnp.float32)
    model = ModelDirectJax("transpose", (2, 4, 16, 32), {"dim0": -2, "dim1": -1})
    out = jax.block_until_ready(model(x))
    ref = jnp.swapaxes(x, -2, -1)
    assert out.shape == ref.shape
    assert jnp.array_equal(out, ref)

    # Many small matrices: exercises the slab-blocked leading axis, including
    # a ragged final slab on the cdiv grid (nb=512 over N=600).
    x_many = jax.random.normal(k2, (600, 16, 32), dtype=jnp.float32)
    out_many = jax.block_until_ready(pallas_transpose_last2(x_many))
    assert jnp.array_equal(out_many, jnp.swapaxes(x_many, -2, -1))

    # Large ragged plane: exercises the 2-D tiled path with a 128-multiple
    # divisor tile (768 -> 384) and a clipped edge block (600 on a 512 tile),
    # with no wrapper-side padding or output slicing.
    x_big = jax.random.normal(k3, (1, 2, 768, 600), dtype=jnp.float32)
    out_big = jax.block_until_ready(pallas_transpose_last2(x_big))
    ref_big = jnp.swapaxes(x_big, -2, -1)
    assert out_big.shape == ref_big.shape
    assert jnp.array_equal(out_big, ref_big)

    print("KERNEL_OK")
</pallas_src>

<mosaic_0001>
module attributes {stable_mosaic.version = 11 : i64} {
  func.func @_transpose_slab_kernel(%arg0: i32, %arg1: memref<8x16x32xf32, #tpu.memory_space<vmem>>, %arg2: memref<8x32x16xf32, #tpu.memory_space<vmem>>) attributes {dimension_semantics = [#tpu.dimension_semantics<parallel>], iteration_bounds = array<i64: 1>, scalar_prefetch = 0 : i64, scratch_operands = 0 : i64, tpu.core_type = #tpu.core_type<tc>, window_params = [{transform_indices = @transform_0, window_bounds = array<i64: 8, 16, 32>}, {transform_indices = @transform_1, window_bounds = array<i64: 8, 32, 16>}]} {
    %c0 = arith.constant 0 : index
    %c0_0 = arith.constant 0 : index
    %c0_1 = arith.constant 0 : index
    %0 = vector.load %arg1[%c0, %c0_0, %c0_1] : memref<8x16x32xf32, #tpu.memory_space<vmem>>, vector<8x16x32xf32>
    %1 = tpu.transpose %0, [0, 2, 1] : vector<8x16x32xf32> -> vector<8x32x16xf32>
    %c0_2 = arith.constant 0 : index
    %c0_3 = arith.constant 0 : index
    %c0_4 = arith.constant 0 : index
    %2 = vector.load %arg2[%c0_2, %c0_3, %c0_4] : memref<8x32x16xf32, #tpu.memory_space<vmem>>, vector<8x32x16xf32>
    tpu.vector_store %arg2[%c0_2, %c0_3, %c0_4], %1 {strides = array<i32>} : memref<8x32x16xf32, #tpu.memory_space<vmem>>, vector<8x32x16xf32>,
    return
  }
  func.func @transform_0(%arg0: i32) -> (i32, i32, i32) {
    %c0_i32 = arith.constant 0 : i32
    %c0_i32_0 = arith.constant 0 : i32
    %c0_i32_1 = arith.constant 0 : i32
    return %arg0, %c0_i32, %c0_i32_0 : i32, i32, i32
  }
  func.func @transform_1(%arg0: i32) -> (i32, i32, i32) {
    %c0_i32 = arith.constant 0 : i32
    %c0_i32_0 = arith.constant 0 : i32
    %c0_i32_1 = arith.constant 0 : i32
    return %arg0, %c0_i32, %c0_i32_0 : i32, i32, i32
  }
}

</mosaic_0001>

<bundles_post_ra>
// kernel: tpu_custom_call.1
= control target key start
LH: loop header
LB: loop body
LE: loop exit
PB: predicated region body
PF: predicated region fallthrough
CT: control target
= control target key end

     0   :  { %6 = vsyncpa [#allocation3], 0  ;;  %s360_s6 = smov [#allocation2]   ;;  %s513_s0 = inlined_call_operand.hbm [shape: f32[8,16,32], index: 0, kind: input, shape index: {}]   ;;  %s514_s1 = inlined_call_operand.vmem [shape: f32[8,32,16], index: 1, kind: output, shape index: {}]  }
   0x1   :  { %s12_s7 = sshll.u32 %s360_s6, 4  ;;  %s336_s10 = scalar_lea.hbm %s513_s0, 2048  ;;  %s13_s7 = int_to_ptr.vmem [resolvable:$true] %s12_s7 }
   0x2   :  { %p337_p0 = scmp.ne.s32.totalorder %s513_s0, %s336_s10  ;;  %p340_p1 = scmp.lt.u32.totalorder %s336_s10, %s513_s0 }
   0x4   :  { %p342_p2 = pnand %p340_p1, %p337_p0 }
   0x6   :  { %345 = shalt.err (!%p342_p2)
}
   0x7   :  { %s346_s15 = scalar_lea.vmem %s13_s7, 2048  ;;  %p351_p4 = scmp.lt.s32.totalorder %s13_s7, %s13_s7 }
   0x8   :  { %p347_p3 = scmp.ne.s32.totalorder %s13_s7, %s346_s15  ;;  %p352_p5 = scmp.lt.s32.totalorder %s346_s15, %s346_s15 }
   0xa   :  { %p353_p6 = por %p352_p5, %p351_p4 }
   0xc   :  { %p354_p7 = pnand %p353_p6, %p347_p3 }
   0xe   :  { %357 = shalt.err (!%p354_p7)
}
   0xf   :  { %s361_s16 = smov 128   ;;  %s362_s17 = smov 8  }
  0x10   :  { %18 = dma.hbm_to_vmem [thread:$0]  %s513_s0, 2048, %s13_s7, [#allocation3], %s361_s16, %s361_s16, %s362_s17  }
  0x11   :  { %358 = dma.done.wait [#allocation3], 2048  }
  0x12   :  { %359 = vsyncadd [#allocation3], 4294965248  ;;  %v24_v0 = vld [vmem:[#allocation2 + $0x10] sm:$0xff]  ;;  %v22_v1 = vld [vmem:[#allocation2] sm:$0xff]  ;;  %vm294_vm0 = vcmask 130048  }
  0x13   :  { %70 = vxpose.xlu1.b32.start [1/2] (short) (narrow) %v24_v0, 32  ;;  %38 = vxpose.xlu0.b32.start [1/2] (short) (narrow) %v22_v1, 32  ;;  %v25_v2 = vld [vmem:[#allocation2 + $0x18] sm:$0xff]  ;;  %v23_v3 = vld [vmem:[#allocation2 + $0x8] sm:$0xff]  ;;  %v28_v4 = vld [vmem:[#allocation2 + $0x30] sm:$0xff] }
  0x14   :  { %v26_v5 = vld [vmem:[#allocation2 + $0x20] sm:$0xff]  ;;  %v29_v6 = vld [vmem:[#allocation2 + $0x38] sm:$0xff]  ;;  %v27_v7 = vld [vmem:[#allocation2 + $0x28] sm:$0xff] }
  0x15   :  { %v32_v8 = vld [vmem:[#allocation2 + $0x50] sm:$0xff]  ;;  %v30_v9 = vld [vmem:[#allocation2 + $0x40] sm:$0xff]  ;;  %v33_v10 = vld [vmem:[#allocation2 + $0x58] sm:$0xff] }
  0x16   :  { %v31_v11 = vld [vmem:[#allocation2 + $0x48] sm:$0xff]  ;;  %v36_v12 = vld [vmem:[#allocation2 + $0x70] sm:$0xff]  ;;  %v34_v13 = vld [vmem:[#allocation2 + $0x60] sm:$0xff] }
  0x17   :  { %71 = vxpose.xlu1.b32.end [2/2] (short) (narrow) %v25_v2, 32  ;;  %39 = vxpose.xlu0.b32.end [2/2] (short) (narrow) %v23_v3, 32  ;;  %v37_v14 = vld [vmem:[#allocation2 + $0x78] sm:$0xff]  ;;  %v35_v15 = vld [vmem:[#allocation2 + $0x68] sm:$0xff] }
  0x20   :  { %134 = vxpose.xlu1.b32.start [1/2] (short) (narrow) %v28_v4, 32  ;;  %102 = vxpose.xlu0.b32.start [1/2] (short) (narrow) %v26_v5, 32 }
  0x24   :  { %135 = vxpose.xlu1.b32.end [2/2] (short) (narrow) %v29_v6, 32  ;;  %103 = vxpose.xlu0.b32.end [2/2] (short) (narrow) %v27_v7, 32 }
  0x2d   :  { %198 = vxpose.xlu1.b32.start [1/2] (short) (narrow) %v32_v8, 32  ;;  %166 = vxpose.xlu0.b32.start [1/2] (short) (narrow) %v30_v9, 32 }
  0x31   :  { %199 = vxpose.xlu1.b32.end [2/2] (short) (narrow) %v33_v10, 32  ;;  %167 = vxpose.xlu0.b32.end [2/2] (short) (narrow) %v31_v11, 32 }
  0x3a   :  { %262 = vxpose.xlu1.b32.start [1/2] (short) (narrow) %v36_v12, 32  ;;  %230 = vxpose.xlu0.b32.start [1/2] (short) (narrow) %v34_v13, 32 }
  0x3e   :  { %263 = vxpose.xlu1.b32.end [2/2] (short) (narrow) %v37_v14, 32  ;;  %231 = vxpose.xlu0.b32.end [2/2] (short) (narrow) %v35_v15, 32 }
  0x93   :  { %v86_v16 = vpop.trf.xlu1  ;;  %v54_v17 = vpop.trf.xlu0 }
  0x94   :  { %299 = vst.msk [vmem:[%s514_s1 + $0x20] sm:$0xff] %vm294_vm0, %v86_v16  ;;  %295 = vst.msk [vmem:[%s514_s1] sm:$0xff] %vm294_vm0, %v54_v17 }
  0x97   :  { %v87_v18 = vpop.trf.xlu1  ;;  %v55_v19 = vpop.trf.xlu0 }
  0x98   :  { %300 = vst.msk [vmem:[%s514_s1 + $0x28] sm:$0xff] %vm294_vm0, %v87_v18  ;;  %296 = vst.msk [vmem:[%s514_s1 + $0x8] sm:$0xff] %vm294_vm0, %v55_v19 }
  0x9b   :  { %v88_v20 = vpop.trf.xlu1  ;;  %v56_v21 = vpop.trf.xlu0 }
  0x9c   :  { %301 = vst.msk [vmem:[%s514_s1 + $0x30] sm:$0xff] %vm294_vm0, %v88_v20  ;;  %297 = vst.msk [vmem:[%s514_s1 + $0x10] sm:$0xff] %vm294_vm0, %v56_v21 }
  0x9f   :  { %v89_v22 = vpop.trf.xlu1  ;;  %v57_v23 = vpop.trf.xlu0 }
  0xa0   :  { %302 = vst.msk [vmem:[%s514_s1 + $0x38] sm:$0xff] %vm294_vm0, %v89_v22  ;;  %298 = vst.msk [vmem:[%s514_s1 + $0x18] sm:$0xff] %vm294_vm0, %v57_v23 }
  0xa3   :  { %v150_v24 = vpop.trf.xlu1  ;;  %v118_v25 = vpop.trf.xlu0 }
  0xa4   :  { %307 = vst.msk [vmem:[%s514_s1 + $0x60] sm:$0xff] %vm294_vm0, %v150_v24  ;;  %303 = vst.msk [vmem:[%s514_s1 + $0x40] sm:$0xff] %vm294_vm0, %v118_v25 }
  0xa7   :  { %v151_v26 = vpop.trf.xlu1  ;;  %v119_v27 = vpop.trf.xlu0 }
  0xa8   :  { %308 = vst.msk [vmem:[%s514_s1 + $0x68] sm:$0xff] %vm294_vm0, %v151_v26  ;;  %304 = vst.msk [vmem:[%s514_s1 + $0x48] sm:$0xff] %vm294_vm0, %v119_v27 }
  0xab   :  { %v152_v28 = vpop.trf.xlu1  ;;  %v120_v29 = vpop.trf.xlu0 }
  0xac   :  { %309 = vst.msk [vmem:[%s514_s1 + $0x70] sm:$0xff] %vm294_vm0, %v152_v28  ;;  %305 = vst.msk [vmem:[%s514_s1 + $0x50] sm:$0xff] %vm294_vm0, %v120_v29 }
  0xaf   :  { %v153_v30 = vpop.trf.xlu1  ;;  %v121_v31 = vpop.trf.xlu0 }
  0xb0   :  { %310 = vst.msk [vmem:[%s514_s1 + $0x78] sm:$0xff] %vm294_vm0, %v153_v30  ;;  %306 = vst.msk [vmem:[%s514_s1 + $0x58] sm:$0xff] %vm294_vm0, %v121_v31 }
  0xb3   :  { %v214_v32 = vpop.trf.xlu1  ;;  %v182_v33 = vpop.trf.xlu0 }
  0xb4   :  { %315 = vst.msk [vmem:[%s514_s1 + $0xa0] sm:$0xff] %vm294_vm0, %v214_v32  ;;  %311 = vst.msk [vmem:[%s514_s1 + $0x80] sm:$0xff] %vm294_vm0, %v182_v33 }
  0xb7   :  { %v215_v34 = vpop.trf.xlu1  ;;  %v183_v35 = vpop.trf.xlu0 }
  0xb8   :  { %316 = vst.msk [vmem:[%s514_s1 + $0xa8] sm:$0xff] %vm294_vm0, %v215_v34  ;;  %312 = vst.msk [vmem:[%s514_s1 + $0x88] sm:$0xff] %vm294_vm0, %v183_v35 }
  0xbb   :  { %v216_v36 = vpop.trf.xlu1  ;;  %v184_v37 = vpop.trf.xlu0 }
  0xbc   :  { %317 = vst.msk [vmem:[%s514_s1 + $0xb0] sm:$0xff] %vm294_vm0, %v216_v36  ;;  %313 = vst.msk [vmem:[%s514_s1 + $0x90] sm:$0xff] %vm294_vm0, %v184_v37 }
  0xbf   :  { %v217_v38 = vpop.trf.xlu1  ;;  %v185_v39 = vpop.trf.xlu0 }
  0xc0   :  { %318 = vst.msk [vmem:[%s514_s1 + $0xb8] sm:$0xff] %vm294_vm0, %v217_v38  ;;  %314 = vst.msk [vmem:[%s514_s1 + $0x98] sm:$0xff] %vm294_vm0, %v185_v39 }
  0xc3   :  { %v278_v40 = vpop.trf.xlu1  ;;  %v246_v41 = vpop.trf.xlu0 }
  0xc4   :  { %323 = vst.msk [vmem:[%s514_s1 + $0xe0] sm:$0xff] %vm294_vm0, %v278_v40  ;;  %319 = vst.msk [vmem:[%s514_s1 + $0xc0] sm:$0xff] %vm294_vm0, %v246_v41 }
  0xc7   :  { %v279_v42 = vpop.trf.xlu1  ;;  %v247_v43 = vpop.trf.xlu0 }
  0xc8   :  { %324 = vst.msk [vmem:[%s514_s1 + $0xe8] sm:$0xff] %vm294_vm0, %v279_v42  ;;  %320 = vst.msk [vmem:[%s514_s1 + $0xc8] sm:$0xff] %vm294_vm0, %v247_v43 }
  0xcb   :  { %v280_v44 = vpop.trf.xlu1  ;;  %v248_v45 = vpop.trf.xlu0 }
  0xcc   :  { %325 = vst.msk [vmem:[%s514_s1 + $0xf0] sm:$0xff] %vm294_vm0, %v280_v44  ;;  %321 = vst.msk [vmem:[%s514_s1 + $0xd0] sm:$0xff] %vm294_vm0, %v248_v45 }
  0xcf   :  { %v281_v46 = vpop.trf.xlu1  ;;  %v249_v47 = vpop.trf.xlu0 }
  0xd0   :  { %326 = vst.msk [vmem:[%s514_s1 + $0xf8] sm:$0xff] %vm294_vm0, %v281_v46  ;;  %322 = vst.msk [vmem:[%s514_s1 + $0xd8] sm:$0xff] %vm294_vm0, %v249_v47 }
  0xd1   :  { %331 = vsyncpa [#allocation3], 1 }

</bundles_post_ra>
